<compile_context>
chip_gen: v5e
topology: v5e:2x2
jax: 0.10.0
libtpu: 0.0.40
codegen_flags: <defaults>
</compile_context>

<pallas_src>
import functools
import math

import jax
import jax.numpy as jnp
from jax import lax
from jax.experimental import pallas as pl
from jax.experimental.pallas import tpu as pltpu


# ---------------------------------------------------------------------------
# Row-tiled linear projection: y = x @ w_t + b   (w_t already (Fin, Fout))
# ---------------------------------------------------------------------------
def _linear_kernel(x_ref, w_ref, b_ref, o_ref):
    acc = jnp.dot(x_ref[...], w_ref[...], preferred_element_type=jnp.float32)
    o_ref[...] = (acc + b_ref[...]).astype(o_ref.dtype)


def pallas_linear(x2d, w_t, b, *, out_dtype=None, row_tile=512):
    """x2d:(N,Fin) @ w_t:(Fin,Fout) + b:(1,Fout) -> (N,Fout)."""
    N, Fin = x2d.shape
    Fout = w_t.shape[1]
    out_dtype = x2d.dtype if out_dtype is None else out_dtype

    # Row tile: full N for small inputs, else a multiple of 8 (row_tile=512).
    tn = N if N <= row_tile else row_tile
    return pl.pallas_call(
        _linear_kernel,
        out_shape=jax.ShapeDtypeStruct((N, Fout), out_dtype),
        grid=(pl.cdiv(N, tn),),
        in_specs=[
            pl.BlockSpec((tn, Fin), lambda i: (i, 0)),
            pl.BlockSpec((Fin, Fout), lambda i: (0, 0)),   # resident weight
            pl.BlockSpec((1, Fout), lambda i: (0, 0)),
        ],
        out_specs=pl.BlockSpec((tn, Fout), lambda i: (i, 0)),
        compiler_params=pltpu.CompilerParams(
            dimension_semantics=("parallel",)),
    )(x2d, w_t, b)


# ---------------------------------------------------------------------------
# Attention kernel: one (batch, head_group, T1-tile) step.
#   q:(tq,fb) k/p/v:(T2,fb) u/vb:(1,fb) keep:(1|tq,T2) out:(tq,fb), fb=hpb*dk
# ---------------------------------------------------------------------------
def _rel_attn_kernel(q_ref, k_ref, p_ref, v_ref, u_ref, vb_ref, keep_ref,
                     o_ref, *, scale, hpb, dk):
    keep = keep_ref[...].astype(jnp.float32)        # 1 = keep, 0 = masked
    neg = (keep - 1.0) * 1e30                       # additive mask bias

    for h in range(hpb):                            # static unroll, hpb small
        lo, hi = h * dk, (h + 1) * dk
        qh = q_ref[:, lo:hi]                        # (tq, dk)
        kh = k_ref[:, lo:hi]                        # (T2, dk)
        ph = p_ref[:, lo:hi]
        vh = v_ref[:, lo:hi]
        uh = u_ref[:, lo:hi]                        # (1, dk)
        vbh = vb_ref[:, lo:hi]

        # Fused score matmul: [q+u | q+v] @ [k | p]^T, contraction K = 2*dk.
        q_cat = jnp.concatenate([qh + uh, qh + vbh], axis=-1)   # (tq, 2dk)
        kp_cat = jnp.concatenate([kh, ph], axis=-1)             # (T2, 2dk)
        s = lax.dot_general(q_cat, kp_cat, (((1,), (1,)), ((), ())),
                            preferred_element_type=jnp.float32)  # (tq, T2)
        s = s * scale + neg

        m = jnp.max(s, axis=-1, keepdims=True)
        e = jnp.exp(s - m)
        denom = jnp.sum(e, axis=-1, keepdims=True)
        attn = e * pl.reciprocal(denom, approx=True)
        attn = attn * keep                           # masked_fill(mask, 0.0)

        ctx = jnp.dot(attn.astype(vh.dtype), vh,
                      preferred_element_type=jnp.float32)        # (tq, dk)
        o_ref[:, lo:hi] = ctx.astype(o_ref.dtype)


def _heads_per_block(n_head, dk):
    """Smallest head group whose feature width is lane-dense (mult of 128)."""
    if dk % 128 == 0:
        return 1
    h = 128 // math.gcd(128, dk)
    if h <= n_head and n_head % h == 0:
        return h
    return n_head           # fall back: full feature dim per block


# ---------------------------------------------------------------------------
# Module forward
# ---------------------------------------------------------------------------
def rel_pos_mha_forward(params, query, key, value, mask, pos_emb, *, n_head,
                        compute_dtype=jnp.bfloat16):
    B, T1, F = query.shape
    T2 = key.shape[1]
    assert F % n_head == 0
    dk = F // n_head
    in_dtype = query.dtype
    cd = compute_dtype

    # --- projections (Pallas, row-tiled, pre-transposed weights) ------------
    def proj(x, w, b, out_dtype):
        return pallas_linear(x.reshape(-1, F).astype(cd),
                             w.T.astype(cd),                 # (Fin, Fout)
                             b.astype(jnp.float32),
                             out_dtype=out_dtype)

    zero_b = jnp.zeros((1, F), jnp.float32)
    q = proj(query, params["wq"], params["bq"], cd).reshape(B, T1, F)
    k = proj(key, params["wk"], params["bk"], cd).reshape(B, T2, F)
    v = proj(value, params["wv"], params["bv"], cd).reshape(B, T2, F)
    p = proj(pos_emb, params["wpos"], zero_b, cd).reshape(1, T2, F)

    u_bias = params["pos_bias_u"].reshape(1, F).astype(cd)   # head-major flat
    v_bias = params["pos_bias_v"].reshape(1, F).astype(cd)
    keep = (mask != 0).astype(jnp.float32)                   # (B, 1|T1, T2)

    # --- attention ------------------------------------------------------------
    hpb = _heads_per_block(n_head, dk)
    fb = hpb * dk                                  # lane-dense feature block
    tq = T1 if T1 <= 128 else 128                  # cap T1 tile (VMEM bound)
    grid = (B, n_head // hpb, pl.cdiv(T1, tq))

    if keep.shape[1] == 1:
        mask_spec = pl.BlockSpec((None, 1, T2), lambda b, g, t: (b, 0, 0))
    else:
        mask_spec = pl.BlockSpec((None, tq, T2), lambda b, g, t: (b, t, 0))

    kernel = functools.partial(_rel_attn_kernel,
                               scale=1.0 / math.sqrt(dk), hpb=hpb, dk=dk)
    ctx = pl.pallas_call(
        kernel,
        out_shape=jax.ShapeDtypeStruct((B, T1, F), cd),
        grid=grid,
        in_specs=[
            pl.BlockSpec((None, tq, fb), lambda b, g, t: (b, t, g)),   # q
            pl.BlockSpec((None, T2, fb), lambda b, g, t: (b, 0, g)),   # k
            pl.BlockSpec((None, T2, fb), lambda b, g, t: (0, 0, g)),   # p shared
            pl.BlockSpec((None, T2, fb), lambda b, g, t: (b, 0, g)),   # v
            pl.BlockSpec((1, fb), lambda b, g, t: (0, g)),             # pos_bias_u
            pl.BlockSpec((1, fb), lambda b, g, t: (0, g)),             # pos_bias_v
            mask_spec,
        ],
        out_specs=pl.BlockSpec((None, tq, fb), lambda b, g, t: (b, t, g)),
        compiler_params=pltpu.CompilerParams(
            dimension_semantics=("parallel", "parallel", "arbitrary"),
            vmem_limit_bytes=48 * 1024 * 1024),
    )(q, k, p, v, u_bias, v_bias, keep)

    # TODO(synk): attention-weight dropout (training mode) not implemented.

    # --- output projection (ctx already in (B, T1, F) layout — no transpose) --
    out = pallas_linear(ctx.reshape(-1, F),
                        params["wout"].T.astype(cd),
                        params["bout"].astype(jnp.float32),
                        out_dtype=in_dtype)
    return out.reshape(B, T1, F)


# ---------------------------------------------------------------------------
# Pure-JAX reference (correctness check)
# ---------------------------------------------------------------------------
def rel_pos_mha_reference(params, query, key, value, mask, pos_emb, *, n_head):
    B, T1, F = query.shape
    dk = F // n_head

    def lin(x, w, b=None):
        y = jnp.einsum("btf,gf->btg", x, w)
        return y if b is None else y + b

    def split_heads(x):
        return x.reshape(x.shape[0], -1, n_head, dk).transpose(0, 2, 1, 3)

    q = split_heads(lin(query, params["wq"], params["bq"]))
    k = split_heads(lin(key, params["wk"], params["bk"]))
    v = split_heads(lin(value, params["wv"], params["bv"]))
    p = split_heads(lin(pos_emb, params["wpos"]))

    qu = q + params["pos_bias_u"][None, :, None, :]
    qv = q + params["pos_bias_v"][None, :, None, :]

    ac = jnp.einsum("bhqd,bhkd->bhqk", qu, k)
    bd = jnp.einsum("bhqd,bhkd->bhqk", qv,
                    jnp.broadcast_to(p, (B,) + p.shape[1:]))
    scores = (ac + bd) / math.sqrt(dk)

    keep = (mask[:, None, :, :] != 0)
    scores = jnp.where(keep, scores, -jnp.inf)
    attn = jax.nn.softmax(scores, axis=-1)
    attn = jnp.where(keep, attn, 0.0)

    x = jnp.einsum("bhqk,bhkd->bhqd", attn, v)
    x = x.transpose(0, 2, 1, 3).reshape(B, T1, F)
    return lin(x, params["wout"], params["bout"])


# ---------------------------------------------------------------------------
# Deterministic parameter init + demo
# ---------------------------------------------------------------------------
def init_params(key, n_feat, n_head, dtype=jnp.float32):
    dk = n_feat // n_head
    keys = jax.random.split(key, 12)
    bound = 1.0 / math.sqrt(n_feat)           # PyTorch nn.Linear default
    xav = math.sqrt(6.0 / (n_head + dk))      # xavier_uniform_ for pos biases

    def w(k):
        return jax.random.uniform(k, (n_feat, n_feat), dtype, -bound, bound)

    def b(k):
        return jax.random.uniform(k, (1, n_feat), dtype, -bound, bound)

    return {
        "wq": w(keys[0]), "bq": b(keys[1]),
        "wk": w(keys[2]), "bk": b(keys[3]),
        "wv": w(keys[4]), "bv": b(keys[5]),
        "wout": w(keys[6]), "bout": b(keys[7]),
        "wpos": w(keys[8]),                               # linear_pos (no bias)
        "pos_bias_u": jax.random.uniform(keys[9], (n_head, dk), dtype, -xav, xav),
        "pos_bias_v": jax.random.uniform(keys[10], (n_head, dk), dtype, -xav, xav),
    }


if __name__ == "__main__":
    B, T, n_feat, n_head = 2, 8, 32, 4

    root = jax.random.PRNGKey(0)
    kp, kq, kk, kv, kpe = jax.random.split(root, 5)

    params = init_params(kp, n_feat, n_head)
    query = jax.random.normal(kq, (B, T, n_feat), jnp.float32)
    key_in = jax.random.normal(kk, (B, T, n_feat), jnp.float32)
    value = jax.random.normal(kv, (B, T, n_feat), jnp.float32)
    pos_emb = jax.random.normal(kpe, (1, T, n_feat), jnp.float32)

    # padding mask: batch 0 has length T, batch 1 has length T-2
    lens = jnp.array([T, T - 2], dtype=jnp.int32)
    mask = (jnp.arange(T)[None, None, :] < lens[:, None, None]).astype(jnp.int32)

    ref = rel_pos_mha_reference(params, query, key_in, value, mask, pos_emb,
                                n_head=n_head)

    # f32 compute path: near-exact vs reference (approx reciprocal only).
    out_f32 = rel_pos_mha_forward(params, query, key_in, value, mask, pos_emb,
                                  n_head=n_head, compute_dtype=jnp.float32)
    out_f32 = jax.block_until_ready(out_f32)
    assert out_f32.shape == (B, T, n_feat)
    assert jnp.allclose(out_f32, ref, atol=3e-3, rtol=3e-3), "f32 mismatch"

    # Default bf16-MXU path (f32 accumulation): looser tolerance.
    out_bf16 = rel_pos_mha_forward(params, query, key_in, value, mask, pos_emb,
                                   n_head=n_head)
    out_bf16 = jax.block_until_ready(out_bf16)
    assert out_bf16.shape == (B, T, n_feat)
    assert jnp.allclose(out_bf16, ref, atol=5e-2, rtol=5e-2), "bf16 mismatch"

    print("KERNEL_OK")
</pallas_src>

<mosaic_0001>
module attributes {stable_mosaic.version = 11 : i64} {
  func.func @_linear_kernel(%arg0: i32, %arg1: memref<16x32xf32, #tpu.memory_space<vmem>>, %arg2: memref<32x32xf32, #tpu.memory_space<vmem>>, %arg3: memref<1x32xf32, #tpu.memory_space<vmem>>, %arg4: memref<16x32xf32, #tpu.memory_space<vmem>>) attributes {dimension_semantics = [#tpu.dimension_semantics<parallel>], iteration_bounds = array<i64: 1>, scalar_prefetch = 0 : i64, scratch_operands = 0 : i64, tpu.core_type = #tpu.core_type<tc>, window_params = [{transform_indices = @transform_0, window_bounds = array<i64: 16, 32>}, {pipeline_mode = #tpu.pipeline_mode<synchronous>, transform_indices = @transform_1, window_bounds = array<i64: 32, 32>}, {pipeline_mode = #tpu.pipeline_mode<synchronous>, transform_indices = @transform_2, window_bounds = array<i64: 1, 32>}, {transform_indices = @transform_3, window_bounds = array<i64: 16, 32>}]} {
    %c0 = arith.constant 0 : index
    %c0_0 = arith.constant 0 : index
    %0 = vector.load %arg1[%c0, %c0_0] : memref<16x32xf32, #tpu.memory_space<vmem>>, vector<16x32xf32>
    %c0_1 = arith.constant 0 : index
    %c0_2 = arith.constant 0 : index
    %1 = vector.load %arg2[%c0_1, %c0_2] : memref<32x32xf32, #tpu.memory_space<vmem>>, vector<32x32xf32>
    %cst = arith.constant dense<0.000000e+00> : vector<16x32xf32>
    %2 = tpu.matmul %0, %1, %cst {dimension_numbers = #tpu.dot_dimension_numbers<[1], [0], [0], [1], [0, 0, 1, 1], [], []>} : vector<16x32xf32>, vector<32x32xf32>, vector<16x32xf32> -> vector<16x32xf32>
    %c0_3 = arith.constant 0 : index
    %c0_4 = arith.constant 0 : index
    %3 = vector.load %arg3[%c0_3, %c0_4] : memref<1x32xf32, #tpu.memory_space<vmem>>, vector<1x32xf32>
    %4 = vector.broadcast %3 : vector<1x32xf32> to vector<16x32xf32>
    %5 = arith.addf %2, %4 : vector<16x32xf32>
    %c0_5 = arith.constant 0 : index
    %c0_6 = arith.constant 0 : index
    %6 = vector.load %arg4[%c0_5, %c0_6] : memref<16x32xf32, #tpu.memory_space<vmem>>, vector<16x32xf32>
    tpu.vector_store %arg4[%c0_5, %c0_6], %5 {strides = array<i32>} : memref<16x32xf32, #tpu.memory_space<vmem>>, vector<16x32xf32>,
    return
  }
  func.func @transform_0(%arg0: i32) -> (i32, i32) {
    %c0_i32 = arith.constant 0 : i32
    %c0_i32_0 = arith.constant 0 : i32
    return %arg0, %c0_i32 : i32, i32
  }
  func.func @transform_1(%arg0: i32) -> (i32, i32) {
    %c0_i32 = arith.constant 0 : i32
    %c0_i32_0 = arith.constant 0 : i32
    %c0_i32_1 = arith.constant 0 : i32
    return %c0_i32, %c0_i32_0 : i32, i32
  }
  func.func @transform_2(%arg0: i32) -> (i32, i32) {
    %c0_i32 = arith.constant 0 : i32
    %c0_i32_0 = arith.constant 0 : i32
    %c0_i32_1 = arith.constant 0 : i32
    return %c0_i32, %c0_i32_0 : i32, i32
  }
  func.func @transform_3(%arg0: i32) -> (i32, i32) {
    %c0_i32 = arith.constant 0 : i32
    %c0_i32_0 = arith.constant 0 : i32
    return %arg0, %c0_i32 : i32, i32
  }
}

</mosaic_0001>

<bundles_post_ra>
// kernel: tpu_custom_call.1
= control target key start
LH: loop header
LB: loop body
LE: loop exit
PB: predicated region body
PF: predicated region fallthrough
CT: control target
= control target key end

     0   :  { %8 = vsyncpa [#allocation3], 0  ;;  %s249_s0 = inlined_call_operand.hbm [shape: f32[16,32], index: 0, kind: input, shape index: {}]   ;;  %s250_s1 = inlined_call_operand.hbm [shape: f32[32,32], index: 1, kind: input, shape index: {}]   ;;  %s251_s2 = inlined_call_operand.vmem [shape: f32[1,32], index: 2, kind: input, shape index: {}]   ;;  %s252_s3 = inlined_call_operand.hbm [shape: f32[16,32], index: 3, kind: output, shape index: {}]  }
   0x1   :  { %9 = vsyncpa [#allocation6], 0 }
   0x2   :  { %10 = vsyncpa [#allocation4], 0  ;;  %s15_s14 = sshll.u32 %s249_s0, 4  ;;  %s199_s15 = smov [#allocation2]   ;;  %s16_s14 = int_to_ptr.hbm [resolvable:$true] %s15_s14 }
   0x3   :  { %s17_s16 = sshll.u32 %s199_s15, 4  ;;  %s28_s19 = sshll.u32 %s250_s1, 4  ;;  %s18_s16 = int_to_ptr.vmem [resolvable:$true] %s17_s16  ;;  %s29_s19 = int_to_ptr.hbm [resolvable:$true] %s28_s19 }
   0x4   :  { %s200_s20 = smov 128   ;;  %s201_s21 = smov 8  }
   0x5   :  { %23 = dma.hbm_to_vmem [thread:$0]  %s16_s14, 256, %s18_s16, [#allocation3], %s200_s20, %s200_s20, %s201_s21  }
   0x6   :  { %s202_s22 = smov [#allocation5]  }
   0x7   :  { %s30_s23 = sshll.u32 %s202_s22, 4  ;;  %s31_s23 = int_to_ptr.vmem [resolvable:$true] %s30_s23 }
   0x8   :  { %36 = dma.hbm_to_vmem [thread:$0]  %s29_s19, 512, %s31_s23, [#allocation6], %s200_s20, %s200_s20, %s201_s21  }
   0x9   :  { %193 = dma.done.wait [#allocation3], 256  }
   0xa   :  { %194 = vsyncadd [#allocation3], 4294967040 }
   0xb   :  { %195 = dma.done.wait [#allocation6], 512  }
   0xc   :  { %196 = vsyncadd [#allocation6], 4294966784  ;;  %v52_v0 = vld [vmem:[#allocation5 + $0x18] sm:$0xff]  ;;  %v51_v1 = vld [vmem:[#allocation5 + $0x10] sm:$0xff]  ;;  %vm57_vm0 = vcmask 261120   ;;  %s203_s24 = smov [#allocation7]  }
   0xd   :  { %76 = vmatpush.msra.mxu0 %v52_v0  ;;  %111 = vmatpush.msra.mxu1 %v52_v0  ;;  %v50_v2 = vld [vmem:[#allocation5 + $0x8] sm:$0xff]  ;;  %v49_v3 = vld [vmem:[#allocation5] sm:$0xff]  ;;  %v47_v4 = vld [vmem:[#allocation2] sm:$0xff]  ;;  %s93_s25 = sshll.u32 %s203_s24, 4  ;;  %s95_s28 = sshll.u32 %s252_s3, 4  ;;  %s94_s25 = int_to_ptr.vmem [resolvable:$true] %s93_s25  ;;  %s96_s28 = int_to_ptr.hbm [resolvable:$true] %s95_s28 }
   0xe   :  { %v48_v5 = vld [vmem:[#allocation2 + $0x8] sm:$0xff]  ;;  %v120_v6 = vld [vmem:[%s251_s2] ss:$0 sm:$0xff] }
   0xf   :  { %77 = vmatpush.msra.mxu0 %v51_v1  ;;  %112 = vmatpush.msra.mxu1 %v51_v1 }
  0x11   :  { %78 = vmatpush.msra.mxu0 %v50_v2  ;;  %113 = vmatpush.msra.mxu1 %v50_v2 }
  0x13   :  { %79 = vmatpush.msra.mxu0 %v49_v3  ;;  %114 = vmatpush.msra.mxu1 %v49_v3 }
  0x14   :  { %109 = vmatmul.msk.f32.vlgmr.msra.gmra.mxu0 %vm57_vm0, %v47_v4  ;;  %110 = vmatmul.msk.f32.vlgmr.msra.gmra.mxu1 %vm57_vm0, %v48_v5 }
  0x91   :  { %v81_v7 = vpop.f32.mrf.mxu0  ;;  %v84_v8 = vpop.f32.mrf.mxu1 }
  0x92   :  { %v82_v9 = vadd.f32 %v120_v6, %v81_v7  ;;  %v85_v10 = vadd.f32 %v120_v6, %v84_v8 }
  0x94   :  { %87 = vst.msk [vmem:[#allocation7] sm:$0xff] %vm57_vm0, %v82_v9 }
  0x95   :  { %88 = vst.msk [vmem:[#allocation7 + $0x8] sm:$0xff] %vm57_vm0, %v85_v10 }
  0x96   :  { %101 = dma.vmem_to_hbm [thread:$0]  %s94_s25, 256, %s96_s28, [#allocation4], %s200_s20, %s200_s20, %s201_s21  }
  0x97   :  { %197 = dma.done.wait [#allocation4], 256  }
  0x98   :  { %198 = vsyncadd [#allocation4], 4294967040 }
  0x99   :  { %106 = vsyncpa [#allocation3], 1 }
  0x9a   :  { %107 = vsyncpa [#allocation6], 1 }
  0x9b   :  { %108 = vsyncpa [#allocation4], 1 }

</bundles_post_ra>
